<compile_context>
chip_gen: v5e
topology: v5e:2x2
jax: 0.10.0
libtpu: 0.0.40
codegen_flags: <defaults>
</compile_context>

<pallas_src>
import jax
import jax.numpy as jnp
from jax.experimental import pallas as pl
from jax.experimental.pallas import tpu as pltpu


def _round_up(x, m):
    return ((x + m - 1) // m) * m


# --------------------------- fused GCN kernel ------------------------------ #

def _gcn_fused_kernel(a_ref, x_ref, w_ref, o_ref, acc_ref):
    # k == 0: zero the resident accumulator for this row-tile of the output.
    @pl.when(pl.program_id(1) == 0)
    def _():
        acc_ref[...] = jnp.zeros_like(acc_ref)

    # H tile = X[k-tile] @ W, computed on the fly (W is fully resident).
    h = jnp.dot(x_ref[...].astype(jnp.bfloat16),
                w_ref[...].astype(jnp.bfloat16),
                preferred_element_type=jnp.float32)

    # out[i-tile] += A_norm[i-tile, k-tile] @ H[k-tile]   (f32 accumulation)
    acc_ref[...] += jnp.dot(a_ref[...].astype(jnp.bfloat16),
                            h.astype(jnp.bfloat16),
                            preferred_element_type=jnp.float32)

    # k == last: one lane-dense store of the finished (tm, Fout_pad) tile.
    @pl.when(pl.program_id(1) == pl.num_programs(1) - 1)
    def _():
        o_ref[...] = acc_ref[...].astype(o_ref.dtype)


def gcn_fused_matmul(a_norm, x, weight, out_dtype=jnp.float32,
                     max_tm=512, max_tk=512):
    """out = a_norm @ (x @ weight) in one tiled, k-accumulating Pallas call.

    a_norm: [N, N] f32, x: [N, Fin] f32, weight: [Fin, Fout] f32.
    Shapes are zero-padded to 128-multiples (lane-dense blocks); the result is
    sliced back to [N, Fout]. Assumes Fin/Fout are small enough for W to live
    fully in VMEM (true for typical GCN layer widths).
    """
    n, fin = x.shape
    fin2, fout = weight.shape
    assert fin == fin2 and a_norm.shape == (n, n)

    tm = min(max_tm, _round_up(n, 128))
    tk = min(max_tk, _round_up(n, 128))
    n_pad = _round_up(n, max(tm, tk))
    fin_p = _round_up(fin, 128)
    fout_p = _round_up(fout, 128)

    a_p = jnp.pad(a_norm, ((0, n_pad - n), (0, n_pad - n)))
    x_p = jnp.pad(x, ((0, n_pad - n), (0, fin_p - fin)))
    w_p = jnp.pad(weight, ((0, fin_p - fin), (0, fout_p - fout)))

    grid = (n_pad // tm, n_pad // tk)

    out = pl.pallas_call(
        _gcn_fused_kernel,
        out_shape=jax.ShapeDtypeStruct((n_pad, fout_p), out_dtype),
        grid_spec=pltpu.PrefetchScalarGridSpec(
            num_scalar_prefetch=0,
            grid=grid,
            in_specs=[
                pl.BlockSpec((tm, tk), lambda i, k: (i, k)),        # A_norm tile
                pl.BlockSpec((tk, fin_p), lambda i, k: (k, 0)),      # X tile
                pl.BlockSpec((fin_p, fout_p), lambda i, k: (0, 0)),  # W resident
            ],
            out_specs=pl.BlockSpec((tm, fout_p), lambda i, k: (i, 0)),
            scratch_shapes=[pltpu.VMEM((tm, fout_p), jnp.float32)],
        ),
        compiler_params=pltpu.CompilerParams(
            dimension_semantics=("parallel", "arbitrary")),
    )(a_p, x_p, w_p)

    return out[:n, :fout]


# ------------------------------ GCN forward -------------------------------- #

def gcn_forward(x, edge_index, weight):
    """x: [N, Fin] f32, edge_index: [2, E] int32, weight: [Fin, Fout] f32."""
    n, _ = x.shape
    row, col = edge_index[0], edge_index[1]

    # Glue: symmetrically normalized dense adjacency from the edge list.
    deg = jnp.zeros((n,), jnp.float32).at[row].add(1.0)            # bincount(row)
    deg_inv_sqrt = jnp.where(deg > 0.0, jax.lax.rsqrt(deg), 0.0)   # inf -> 0
    norm = deg_inv_sqrt[row] * deg_inv_sqrt[col]                   # [E]
    a_norm = jnp.zeros((n, n), jnp.float32).at[row, col].add(norm)
    # TODO(synk): for large, genuinely sparse graphs replace the dense A_norm
    # with a scalar-prefetched CSR gather/scatter kernel instead of densifying.

    # Fused: out = A_norm @ (X @ W) in a single pipelined Pallas kernel.
    return gcn_fused_matmul(a_norm, x, weight, out_dtype=x.dtype)


def gcn_reference(x, edge_index, weight):
    """Pure-JAX (f32) transcription of the PyTorch forward (edge scatter)."""
    n = x.shape[0]
    row, col = edge_index[0], edge_index[1]
    deg = jnp.zeros((n,), jnp.float32).at[row].add(1.0)
    deg_inv_sqrt = jnp.where(deg > 0.0, 1.0 / jnp.sqrt(deg), 0.0)
    norm = deg_inv_sqrt[row] * deg_inv_sqrt[col]
    h = x @ weight
    out = jnp.zeros_like(h).at[row].add(h[col] * norm[:, None])
    return out


if __name__ == "__main__":
    N, F_IN, F_OUT = 16, 32, 32

    key = jax.random.PRNGKey(0)
    kx, kw = jax.random.split(key)
    x = jax.random.normal(kx, (N, F_IN), dtype=jnp.float32)
    weight = jax.random.normal(kw, (F_IN, F_OUT), dtype=jnp.float32)

    # Deterministic small graph: bidirectional ring over N nodes -> E = 2N.
    src = jnp.arange(N, dtype=jnp.int32)
    dst = (src + 1) % N
    row = jnp.concatenate([src, dst])
    col = jnp.concatenate([dst, src])
    edge_index = jnp.stack([row, col], axis=0)  # [2, E], E = 32

    out = gcn_forward(x, edge_index, weight)
    out = jax.block_until_ready(out)

    ref = gcn_reference(x, edge_index, weight)
    assert out.shape == (N, F_OUT) and out.dtype == jnp.float32
    # bf16 MXU inputs / f32 accumulation -> relaxed tolerance vs f32 reference.
    assert jnp.allclose(out, ref, atol=1e-1, rtol=3e-2), (
        float(jnp.max(jnp.abs(out - ref))))

    print("KERNEL_OK")
</pallas_src>

<mosaic_0001>
module attributes {stable_mosaic.version = 11 : i64} {
  func.func @_gcn_fused_kernel(%arg0: i32, %arg1: i32, %arg2: memref<128x128xf32, #tpu.memory_space<vmem>>, %arg3: memref<128x128xf32, #tpu.memory_space<vmem>>, %arg4: memref<128x128xf32, #tpu.memory_space<vmem>>, %arg5: memref<128x128xf32, #tpu.memory_space<vmem>>, %arg6: memref<128x128xf32, #tpu.memory_space<vmem>>) attributes {dimension_semantics = [#tpu.dimension_semantics<parallel>, #tpu.dimension_semantics<arbitrary>], iteration_bounds = array<i64: 1, 1>, scalar_prefetch = 0 : i64, scratch_operands = 1 : i64, tpu.core_type = #tpu.core_type<tc>, window_params = [{transform_indices = @transform_0, window_bounds = array<i64: 128, 128>}, {transform_indices = @transform_1, window_bounds = array<i64: 128, 128>}, {pipeline_mode = #tpu.pipeline_mode<synchronous>, transform_indices = @transform_2, window_bounds = array<i64: 128, 128>}, {transform_indices = @transform_3, window_bounds = array<i64: 128, 128>}]} {
    %c0_i32 = arith.constant 0 : i32
    %0 = arith.cmpi eq, %arg1, %c0_i32 : i32
    %1 = arith.extui %0 : i1 to i32
    %c0_i32_0 = arith.constant 0 : i32
    %2 = arith.cmpi ne, %1, %c0_i32_0 : i32
    scf.if %2 {
      %cst_13 = arith.constant 0.000000e+00 : f32
      %18 = vector.broadcast %cst_13 : f32 to vector<128x128xf32>
      %c0_14 = arith.constant 0 : index
      %c0_15 = arith.constant 0 : index
      %19 = vector.load %arg6[%c0_14, %c0_15] : memref<128x128xf32, #tpu.memory_space<vmem>>, vector<128x128xf32>
      tpu.vector_store %arg6[%c0_14, %c0_15], %18 {strides = array<i32>} : memref<128x128xf32, #tpu.memory_space<vmem>>, vector<128x128xf32>,
    } else {
    }
    %c0 = arith.constant 0 : index
    %c0_1 = arith.constant 0 : index
    %3 = vector.load %arg3[%c0, %c0_1] : memref<128x128xf32, #tpu.memory_space<vmem>>, vector<128x128xf32>
    %4 = arith.truncf %3 : vector<128x128xf32> to vector<128x128xbf16>
    %c0_2 = arith.constant 0 : index
    %c0_3 = arith.constant 0 : index
    %5 = vector.load %arg4[%c0_2, %c0_3] : memref<128x128xf32, #tpu.memory_space<vmem>>, vector<128x128xf32>
    %6 = arith.truncf %5 : vector<128x128xf32> to vector<128x128xbf16>
    %cst = arith.constant dense<0.000000e+00> : vector<128x128xf32>
    %7 = tpu.matmul %4, %6, %cst {dimension_numbers = #tpu.dot_dimension_numbers<[1], [0], [0], [1], [0, 0, 1, 1], [], []>} : vector<128x128xbf16>, vector<128x128xbf16>, vector<128x128xf32> -> vector<128x128xf32>
    %c0_4 = arith.constant 0 : index
    %c0_5 = arith.constant 0 : index
    %8 = vector.load %arg6[%c0_4, %c0_5] : memref<128x128xf32, #tpu.memory_space<vmem>>, vector<128x128xf32>
    %c0_6 = arith.constant 0 : index
    %c0_7 = arith.constant 0 : index
    %9 = vector.load %arg2[%c0_6, %c0_7] : memref<128x128xf32, #tpu.memory_space<vmem>>, vector<128x128xf32>
    %10 = arith.truncf %9 : vector<128x128xf32> to vector<128x128xbf16>
    %11 = arith.truncf %7 : vector<128x128xf32> to vector<128x128xbf16>
    %cst_8 = arith.constant dense<0.000000e+00> : vector<128x128xf32>
    %12 = tpu.matmul %10, %11, %cst_8 {dimension_numbers = #tpu.dot_dimension_numbers<[1], [0], [0], [1], [0, 0, 1, 1], [], []>} : vector<128x128xbf16>, vector<128x128xbf16>, vector<128x128xf32> -> vector<128x128xf32>
    %13 = arith.addf %8, %12 : vector<128x128xf32>
    %c0_9 = arith.constant 0 : index
    %c0_10 = arith.constant 0 : index
    %14 = vector.load %arg6[%c0_9, %c0_10] : memref<128x128xf32, #tpu.memory_space<vmem>>, vector<128x128xf32>
    tpu.vector_store %arg6[%c0_9, %c0_10], %13 {strides = array<i32>} : memref<128x128xf32, #tpu.memory_space<vmem>>, vector<128x128xf32>,
    %c0_i32_11 = arith.constant 0 : i32
    %15 = arith.cmpi eq, %arg1, %c0_i32_11 : i32
    %16 = arith.extui %15 : i1 to i32
    %c0_i32_12 = arith.constant 0 : i32
    %17 = arith.cmpi ne, %16, %c0_i32_12 : i32
    scf.if %17 {
      %c0_13 = arith.constant 0 : index
      %c0_14 = arith.constant 0 : index
      %18 = vector.load %arg6[%c0_13, %c0_14] : memref<128x128xf32, #tpu.memory_space<vmem>>, vector<128x128xf32>
      %c0_15 = arith.constant 0 : index
      %c0_16 = arith.constant 0 : index
      %19 = vector.load %arg5[%c0_15, %c0_16] : memref<128x128xf32, #tpu.memory_space<vmem>>, vector<128x128xf32>
      tpu.vector_store %arg5[%c0_15, %c0_16], %18 {strides = array<i32>} : memref<128x128xf32, #tpu.memory_space<vmem>>, vector<128x128xf32>,
    } else {
    }
    return
  }
  func.func @transform_0(%arg0: i32, %arg1: i32) -> (i32, i32) {
    %c0_i32 = arith.constant 0 : i32
    return %arg0, %arg1 : i32, i32
  }
  func.func @transform_1(%arg0: i32, %arg1: i32) -> (i32, i32) {
    %c0_i32 = arith.constant 0 : i32
    %c0_i32_0 = arith.constant 0 : i32
    return %arg1, %c0_i32 : i32, i32
  }
  func.func @transform_2(%arg0: i32, %arg1: i32) -> (i32, i32) {
    %c0_i32 = arith.constant 0 : i32
    %c0_i32_0 = arith.constant 0 : i32
    %c0_i32_1 = arith.constant 0 : i32
    return %c0_i32, %c0_i32_0 : i32, i32
  }
  func.func @transform_3(%arg0: i32, %arg1: i32) -> (i32, i32) {
    %c0_i32 = arith.constant 0 : i32
    %c0_i32_0 = arith.constant 0 : i32
    return %arg0, %c0_i32 : i32, i32
  }
}

</mosaic_0001>

<bundles_post_ra>
// kernel: tpu_custom_call.1
= control target key start
LH: loop header
LB: loop body
LE: loop exit
PB: predicated region body
PF: predicated region fallthrough
CT: control target
= control target key end

     0   :  { %8 = vsyncpa [#allocation4], 0  ;;  %s537_s0 = inlined_call_operand.hbm [shape: f32[128,128], index: 0, kind: input, shape index: {}]   ;;  %s538_s1 = inlined_call_operand.hbm [shape: f32[128,128], index: 1, kind: input, shape index: {}]   ;;  %s539_s2 = inlined_call_operand.hbm [shape: f32[128,128], index: 2, kind: input, shape index: {}]   ;;  %s540_s3 = inlined_call_operand.hbm [shape: f32[128,128], index: 3, kind: output, shape index: {}]  }
   0x1   :  { %9 = vsyncpa [#allocation7], 0 }
   0x2   :  { %10 = vsyncpa [#allocation5], 0  ;;  %s28_s14 = sshll.u32 %s538_s1, 4  ;;  %s487_s15 = smov [#allocation6]   ;;  %s29_s14 = int_to_ptr.hbm [resolvable:$true] %s28_s14 }
   0x3   :  { %s30_s16 = sshll.u32 %s487_s15, 4  ;;  %s15_s19 = sshll.u32 %s537_s0, 4  ;;  %s31_s16 = int_to_ptr.vmem [resolvable:$true] %s30_s16  ;;  %s16_s19 = int_to_ptr.hbm [resolvable:$true] %s15_s19 }
   0x4   :  { %s488_s20 = smov 128   ;;  %s489_s21 = smov 8  }
   0x5   :  { %36 = dma.hbm_to_vmem [thread:$0]  %s29_s14, 2048, %s31_s16, [#allocation7], %s488_s20, %s488_s20, %s489_s21  }
   0x6   :  { %s490_s22 = smov [#allocation3]   ;;  %s41_s1 = sshll.u32 %s539_s2, 4  ;;  %s42_s1 = int_to_ptr.hbm [resolvable:$true] %s41_s1 }
   0x7   :  { %s17_s23 = sshll.u32 %s490_s22, 4  ;;  %s491_s0 = smov [#allocation8]   ;;  %s18_s23 = int_to_ptr.vmem [resolvable:$true] %s17_s23 }
   0x8   :  { %23 = dma.hbm_to_vmem [thread:$0]  %s16_s19, 2048, %s18_s23, [#allocation4], %s488_s20, %s488_s20, %s489_s21  }
   0x9   :  { %s43_s26 = sshll.u32 %s491_s0, 4  ;;  %s44_s26 = int_to_ptr.vmem [resolvable:$true] %s43_s26 }
   0xa   :  { %49 = dma.hbm_to_vmem [thread:$0]  %s42_s1, 2048, %s44_s26, [#allocation7], %s488_s20, %s488_s20, %s489_s21  }
   0xb   :  { %481 = dma.done.wait [#allocation4], 2048  }
   0xc   :  { %482 = vsyncadd [#allocation4], 4294965248 }
   0xd   :  { %483 = dma.done.wait [#allocation7], 4096  }
   0xe   :  { %484 = vsyncadd [#allocation7], 4294963200  ;;  %v120_v0 = vld [vmem:[#allocation8 + $0x70] sm:$0xff]  ;;  %v121_v1 = vld [vmem:[#allocation8 + $0x78] sm:$0xff]  ;;  %s492_s2 = smov [#allocation9]   ;;  %s349_s30 = sshll.u32 %s540_s3, 4  ;;  %s350_s30 = int_to_ptr.hbm [resolvable:$true] %s349_s30 }
   0xf   :  { %v118_v2 = vld [vmem:[#allocation8 + $0x60] sm:$0xff]  ;;  %v129_v3 = vpack.c.bf16 %v121_v1, %v120_v0  ;;  %v119_v4 = vld [vmem:[#allocation8 + $0x68] sm:$0xff]  ;;  %v116_v6 = vld [vmem:[#allocation8 + $0x50] sm:$0xff]  ;;  %s347_s27 = sshll.u32 %s492_s2, 4  ;;  %s348_s27 = int_to_ptr.vmem [resolvable:$true] %s347_s27 }
  0x10   :  { %v128_v5 = vpack.c.bf16 %v119_v4, %v118_v2  ;;  %v117_v7 = vld [vmem:[#allocation8 + $0x58] sm:$0xff]  ;;  %v114_v9 = vld [vmem:[#allocation8 + $0x40] sm:$0xff]  ;;  %v115_v10 = vld [vmem:[#allocation8 + $0x48] sm:$0xff] }
  0x11   :  { %363 = vmatpush.bf16.msra.mxu2 %v129_v3  ;;  %130 = vmatpush.bf16.msra.mxu0 %v129_v3  ;;  %v127_v8 = vpack.c.bf16 %v117_v7, %v116_v6  ;;  %v126_v11 = vpack.c.bf16 %v115_v10, %v114_v9  ;;  %v112_v12 = vld [vmem:[#allocation8 + $0x30] sm:$0xff]  ;;  %v113_v13 = vld [vmem:[#allocation8 + $0x38] sm:$0xff]  ;;  %v110_v15 = vld [vmem:[#allocation8 + $0x20] sm:$0xff] }
  0x12   :  { %v125_v14 = vpack.c.bf16 %v113_v13, %v112_v12  ;;  %v111_v16 = vld [vmem:[#allocation8 + $0x28] sm:$0xff]  ;;  %v108_v18 = vld [vmem:[#allocation8 + $0x10] sm:$0xff]  ;;  %v109_v19 = vld [vmem:[#allocation8 + $0x18] sm:$0xff] }
  0x13   :  { %v124_v17 = vpack.c.bf16 %v111_v16, %v110_v15  ;;  %v123_v20 = vpack.c.bf16 %v109_v19, %v108_v18  ;;  %v106_v21 = vld [vmem:[#allocation8] sm:$0xff]  ;;  %v107_v22 = vld [vmem:[#allocation8 + $0x8] sm:$0xff]  ;;  %v92_v30 = vld [vmem:[#allocation6 + $0x50] sm:$0xff] }
  0x14   :  { %v90_v23 = vld [vmem:[#allocation6 + $0x40] sm:$0xff]  ;;  %v122_v24 = vpack.c.bf16 %v107_v22, %v106_v21  ;;  %v91_v25 = vld [vmem:[#allocation6 + $0x48] sm:$0xff]  ;;  %v93_v31 = vld [vmem:[#allocation6 + $0x58] sm:$0xff] }
  0x15   :  { %364 = vmatpush.bf16.msra.mxu2 %v128_v5  ;;  %131 = vmatpush.bf16.msra.mxu0 %v128_v5  ;;  %v82_v26 = vld [vmem:[#allocation6] sm:$0xff]  ;;  %v83_v27 = vld [vmem:[#allocation6 + $0x8] sm:$0xff]  ;;  %v102_v28 = vpack.c.bf16 %v91_v25, %v90_v23  ;;  %v84_v32 = vld [vmem:[#allocation6 + $0x10] sm:$0xff]  ;;  %v103_v34 = vpack.c.bf16 %v93_v31, %v92_v30 }
  0x16   :  { %v98_v29 = vpack.c.bf16 %v83_v27, %v82_v26  ;;  %v85_v33 = vld [vmem:[#allocation6 + $0x18] sm:$0xff]  ;;  %v94_v36 = vld [vmem:[#allocation6 + $0x60] sm:$0xff]  ;;  %v95_v37 = vld [vmem:[#allocation6 + $0x68] sm:$0xff] }
  0x17   :  { %v99_v35 = vpack.c.bf16 %v85_v33, %v84_v32  ;;  %v86_v38 = vld [vmem:[#allocation6 + $0x20] sm:$0xff]  ;;  %v87_v39 = vld [vmem:[#allocation6 + $0x28] sm:$0xff]  ;;  %v104_v40 = vpack.c.bf16 %v95_v37, %v94_v36  ;;  %v96_v42 = vld [vmem:[#allocation6 + $0x70] sm:$0xff] }
  0x18   :  { %v100_v41 = vpack.c.bf16 %v87_v39, %v86_v38  ;;  %v97_v43 = vld [vmem:[#allocation6 + $0x78] sm:$0xff]  ;;  %v88_v44 = vld [vmem:[#allocation6 + $0x30] sm:$0xff]  ;;  %v195_v7 = vld [vmem:[#allocation3] sm:$0xff] }
  0x19   :  { %365 = vmatpush.bf16.msra.mxu2 %v127_v8  ;;  %132 = vmatpush.bf16.msra.mxu0 %v127_v8  ;;  %v89_v45 = vld [vmem:[#allocation6 + $0x38] sm:$0xff]  ;;  %v105_v46 = vpack.c.bf16 %v97_v43, %v96_v42  ;;  %v196_v8 = vld [vmem:[#allocation3 + $0x8] sm:$0xff]  ;;  %v203_v9 = vld [vmem:[#allocation3 + $0x40] sm:$0xff] }
  0x1a   :  { %v101_v47 = vpack.c.bf16 %v89_v45, %v88_v44  ;;  %v204_v10 = vld [vmem:[#allocation3 + $0x48] sm:$0xff]  ;;  %v211_v12 = vpack.c.bf16 %v196_v8, %v195_v7  ;;  %v198_v15 = vld [vmem:[#allocation3 + $0x18] sm:$0xff]  ;;  %v205_v16 = vld [vmem:[#allocation3 + $0x50] sm:$0xff] }
  0x1b   :  { %v215_v13 = vpack.c.bf16 %v204_v10, %v203_v9  ;;  %v200_v21 = vld [vmem:[#allocation3 + $0x28] sm:$0xff]  ;;  %v207_v22 = vld [vmem:[#allocation3 + $0x60] sm:$0xff]  ;;  %v201_v26 = vld [vmem:[#allocation3 + $0x30] sm:$0xff] }
  0x1c   :  { %v208_v23 = vld [vmem:[#allocation3 + $0x68] sm:$0xff]  ;;  %v202_v27 = vld [vmem:[#allocation3 + $0x38] sm:$0xff] }
  0x1d   :  { %366 = vmatpush.bf16.msra.mxu2 %v126_v11  ;;  %133 = vmatpush.bf16.msra.mxu0 %v126_v11  ;;  %v217_v25 = vpack.c.bf16 %v208_v23, %v207_v22  ;;  %v214_v30 = vpack.c.bf16 %v202_v27, %v201_v26 }
  0x21   :  { %367 = vmatpush.bf16.msra.mxu2 %v125_v14  ;;  %134 = vmatpush.bf16.msra.mxu0 %v125_v14  ;;  %v197_v14 = vld [vmem:[#allocation3 + $0x10] sm:$0xff] }
  0x22   :  { %v212_v18 = vpack.c.bf16 %v198_v15, %v197_v14 }
  0x25   :  { %368 = vmatpush.bf16.msra.mxu2 %v124_v17  ;;  %135 = vmatpush.bf16.msra.mxu0 %v124_v17  ;;  %v206_v17 = vld [vmem:[#allocation3 + $0x58] sm:$0xff] }
  0x26   :  { %v216_v19 = vpack.c.bf16 %v206_v17, %v205_v16 }
  0x29   :  { %369 = vmatpush.bf16.msra.mxu2 %v123_v20  ;;  %136 = vmatpush.bf16.msra.mxu0 %v123_v20  ;;  %v199_v20 = vld [vmem:[#allocation3 + $0x20] sm:$0xff] }
  0x2d   :  { %370 = vmatpush.bf16.msra.mxu2 %v122_v24  ;;  %137 = vmatpush.bf16.msra.mxu0 %v122_v24  ;;  %v213_v24 = vpack.c.bf16 %v200_v21, %v199_v20 }
  0x30   :  { %158 = vmatmul.bf16.vlgmr.msra.gmra.mxu2 %v102_v28  ;;  %138 = vmatmul.bf16.vlgmr.msra.gmra.mxu0 %v98_v29  ;;  %v209_v28 = vld [vmem:[#allocation3 + $0x70] sm:$0xff]  ;;  %v210_v29 = vld [vmem:[#allocation3 + $0x78] sm:$0xff] }
  0x31   :  { %v218_v31 = vpack.c.bf16 %v210_v29, %v209_v28 }
  0x40   :  { %163 = vmatmul.bf16.gmra.mxu2 %v103_v34  ;;  %143 = vmatmul.bf16.gmra.mxu0 %v99_v35 }
  0x50   :  { %168 = vmatmul.bf16.gmra.mxu2 %v104_v40  ;;  %148 = vmatmul.bf16.gmra.mxu0 %v100_v41 }
  0x60   :  { %173 = vmatmul.bf16.gmra.mxu2 %v105_v46  ;;  %153 = vmatmul.bf16.gmra.mxu0 %v101_v47 }
  0xad   :  { %v139_v49 = vpop.f32.mrf.mxu0 }
  0xb3   :  { %v159_v48 = vpop.f32.mrf.mxu2 }
  0xb5   :  { %v141_v51 = vpop.f32.mrf.mxu0 }
  0xb6   :  { %v219_v11 = vpack.c.bf16 %v141_v51, %v139_v49 }
  0xbb   :  { %v161_v50 = vpop.f32.mrf.mxu2 }
  0xbc   :  { %v223_v2 = vpack.c.bf16 %v161_v50, %v159_v48 }
  0xbd   :  { %v144_v53 = vpop.f32.mrf.mxu0 }
  0xc3   :  { %v164_v52 = vpop.f32.mrf.mxu2 }
  0xc5   :  { %v146_v55 = vpop.f32.mrf.mxu0 }
  0xc6   :  { %v220_v6 = vpack.c.bf16 %v146_v55, %v144_v53 }
  0xcb   :  { %v166_v54 = vpop.f32.mrf.mxu2 }
  0xcc   :  { %v224_v1 = vpack.c.bf16 %v166_v54, %v164_v52 }
  0xcd   :  { %v149_v57 = vpop.f32.mrf.mxu0 }
  0xd3   :  { %v169_v56 = vpop.f32.mrf.mxu2 }
  0xd5   :  { %v151_v60 = vpop.f32.mrf.mxu0 }
  0xd6   :  { %v221_v5 = vpack.c.bf16 %v151_v60, %v149_v57 }
  0xdb   :  { %v171_v58 = vpop.f32.mrf.mxu2 }
  0xdc   :  { %v225_v0 = vpack.c.bf16 %v171_v58, %v169_v56 }
  0xdd   :  { %v154_v63 = vpop.f32.mrf.mxu0 }
  0xe3   :  { %v174_v59 = vpop.f32.mrf.mxu2 }
  0xe5   :  { %v156_v3 = vpop.f32.mrf.mxu0 }
  0xe6   :  { %v222_v4 = vpack.c.bf16 %v156_v3, %v154_v63 }
  0xeb   :  { %v176_v61 = vpop.f32.mrf.mxu2 }
  0xec   :  { %v226_v62 = vpack.c.bf16 %v176_v61, %v174_v59 }
  0xee   :  { %227 = vmatpush.bf16.msra.mxu1 %v226_v62  ;;  %371 = vmatpush.bf16.msra.mxu3 %v226_v62 }
  0xf2   :  { %228 = vmatpush.bf16.msra.mxu1 %v225_v0  ;;  %372 = vmatpush.bf16.msra.mxu3 %v225_v0 }
  0xf6   :  { %229 = vmatpush.bf16.msra.mxu1 %v224_v1  ;;  %373 = vmatpush.bf16.msra.mxu3 %v224_v1 }
  0xfa   :  { %230 = vmatpush.bf16.msra.mxu1 %v223_v2  ;;  %374 = vmatpush.bf16.msra.mxu3 %v223_v2 }
  0xfe   :  { %231 = vmatpush.bf16.msra.mxu1 %v222_v4  ;;  %375 = vmatpush.bf16.msra.mxu3 %v222_v4 }
 0x102   :  { %232 = vmatpush.bf16.msra.mxu1 %v221_v5  ;;  %376 = vmatpush.bf16.msra.mxu3 %v221_v5 }
 0x106   :  { %233 = vmatpush.bf16.msra.mxu1 %v220_v6  ;;  %377 = vmatpush.bf16.msra.mxu3 %v220_v6 }
 0x10a   :  { %234 = vmatpush.bf16.msra.mxu1 %v219_v11  ;;  %378 = vmatpush.bf16.msra.mxu3 %v219_v11 }
 0x10d   :  { %235 = vmatmul.bf16.vlgmr.msra.gmra.mxu1 %v211_v12  ;;  %255 = vmatmul.bf16.vlgmr.msra.gmra.mxu3 %v215_v13 }
 0x11d   :  { %240 = vmatmul.bf16.gmra.mxu1 %v212_v18  ;;  %260 = vmatmul.bf16.gmra.mxu3 %v216_v19 }
 0x12d   :  { %245 = vmatmul.bf16.gmra.mxu1 %v213_v24  ;;  %265 = vmatmul.bf16.gmra.mxu3 %v217_v25 }
 0x13d   :  { %250 = vmatmul.bf16.gmra.mxu1 %v214_v30  ;;  %270 = vmatmul.bf16.gmra.mxu3 %v218_v31 }
 0x18a   :  { %v236_v32 = vpop.f32.mrf.mxu1 }
 0x18b   :  { %327 = vst [vmem:[#allocation9] sm:$0xff] %v236_v32 }
 0x190   :  { %v256_v33 = vpop.f32.mrf.mxu3 }
 0x191   :  { %335 = vst [vmem:[#allocation9 + $0x40] sm:$0xff] %v256_v33 }
 0x192   :  { %v238_v34 = vpop.f32.mrf.mxu1 }
 0x193   :  { %328 = vst [vmem:[#allocation9 + $0x8] sm:$0xff] %v238_v34 }
 0x198   :  { %v258_v35 = vpop.f32.mrf.mxu3 }
 0x199   :  { %336 = vst [vmem:[#allocation9 + $0x48] sm:$0xff] %v258_v35 }
 0x19a   :  { %v241_v36 = vpop.f32.mrf.mxu1 }
 0x19b   :  { %329 = vst [vmem:[#allocation9 + $0x10] sm:$0xff] %v241_v36 }
 0x1a0   :  { %v261_v37 = vpop.f32.mrf.mxu3 }
 0x1a1   :  { %337 = vst [vmem:[#allocation9 + $0x50] sm:$0xff] %v261_v37 }
 0x1a2   :  { %v243_v38 = vpop.f32.mrf.mxu1 }
 0x1a3   :  { %330 = vst [vmem:[#allocation9 + $0x18] sm:$0xff] %v243_v38 }
 0x1a8   :  { %v263_v39 = vpop.f32.mrf.mxu3 }
 0x1a9   :  { %338 = vst [vmem:[#allocation9 + $0x58] sm:$0xff] %v263_v39 }
 0x1aa   :  { %v246_v40 = vpop.f32.mrf.mxu1 }
 0x1ab   :  { %331 = vst [vmem:[#allocation9 + $0x20] sm:$0xff] %v246_v40 }
 0x1b0   :  { %v266_v41 = vpop.f32.mrf.mxu3 }
 0x1b1   :  { %339 = vst [vmem:[#allocation9 + $0x60] sm:$0xff] %v266_v41 }
 0x1b2   :  { %v248_v42 = vpop.f32.mrf.mxu1 }
 0x1b3   :  { %332 = vst [vmem:[#allocation9 + $0x28] sm:$0xff] %v248_v42 }
 0x1b8   :  { %v268_v43 = vpop.f32.mrf.mxu3 }
 0x1b9   :  { %340 = vst [vmem:[#allocation9 + $0x68] sm:$0xff] %v268_v43 }
 0x1ba   :  { %v251_v44 = vpop.f32.mrf.mxu1 }
 0x1bb   :  { %333 = vst [vmem:[#allocation9 + $0x30] sm:$0xff] %v251_v44 }
 0x1c0   :  { %v271_v45 = vpop.f32.mrf.mxu3 }
 0x1c1   :  { %341 = vst [vmem:[#allocation9 + $0x70] sm:$0xff] %v271_v45 }
 0x1c2   :  { %v253_v46 = vpop.f32.mrf.mxu1 }
 0x1c3   :  { %334 = vst [vmem:[#allocation9 + $0x38] sm:$0xff] %v253_v46 }
 0x1c8   :  { %v273_v47 = vpop.f32.mrf.mxu3 }
 0x1c9   :  { %342 = vst [vmem:[#allocation9 + $0x78] sm:$0xff] %v273_v47 }
 0x1ca   :  { %355 = dma.vmem_to_hbm [thread:$0]  %s348_s27, 2048, %s350_s30, [#allocation5], %s488_s20, %s488_s20, %s489_s21  }
 0x1cb   :  { %485 = dma.done.wait [#allocation5], 2048  }
 0x1cc   :  { %486 = vsyncadd [#allocation5], 4294965248 }
 0x1cd   :  { %360 = vsyncpa [#allocation4], 1 }
 0x1ce   :  { %361 = vsyncpa [#allocation7], 1 }
 0x1cf   :  { %362 = vsyncpa [#allocation5], 1 }

</bundles_post_ra>
